<compile_context>
chip_gen: v6e
topology: v6e:2x2x1
jax: 0.10.0
libtpu: 0.0.40
codegen_flags: <defaults>
</compile_context>

<pallas_src>
import jax
import jax.numpy as jnp
from jax.experimental import pallas as pl
from jax.experimental.pallas import tpu as pltpu


# ---------------------------------------------------------------------------
# Kernel: y = x * scale + shift  (scale/shift are per-row, broadcast on lanes)
# ---------------------------------------------------------------------------
def _bn_scale_shift_kernel(x_ref, scale_ref, shift_ref, o_ref):
    # x_ref:     (bc, ts) tile of the (N*C, H*W) slab
    # scale_ref: (bc, 1)  per-row folded scale  (broadcasts along lane axis)
    # shift_ref: (bc, 1)  per-row folded shift
    o_ref[...] = x_ref[...] * scale_ref[...] + shift_ref[...]


_MAX_LANE_TILE = 2048          # lane-axis tile (multiple of 128)
_MAX_TILE_ELEMS = 512 * 1024   # per-block element budget (f32 -> 2 MiB / buffer)


def _bn_apply_pallas(x2d, row_scale, row_shift):
    """x2d: (rows, cols) f32 slab; row_scale/row_shift: (rows, 1) f32."""
    rows, cols = x2d.shape

    # Lane tile: full width when it fits, else a 128-multiple chunk.
    ts = cols if cols <= _MAX_LANE_TILE else _MAX_LANE_TILE

    # Sublane tile: fill the per-block budget; multiple of 8 (or the full dim).
    budget_rows = max(8, (_MAX_TILE_ELEMS // max(ts, 1)) // 8 * 8)
    bc = rows if rows <= budget_rows else budget_rows

    grid = (pl.cdiv(rows, bc), pl.cdiv(cols, ts))

    # VMEM budget: ~2 input + 2 output double-buffered tiles + tiny param tiles.
    block_bytes = bc * ts * x2d.dtype.itemsize
    vmem_need = 4 * block_bytes + 4 * bc * 4 * 2 + (1 << 20)
    vmem_limit = int(min(max(vmem_need, 8 << 20), 32 << 20))

    return pl.pallas_call(
        _bn_scale_shift_kernel,
        out_shape=jax.ShapeDtypeStruct((rows, cols), x2d.dtype),
        grid=grid,
        in_specs=[
            pl.BlockSpec((bc, ts), lambda i, j: (i, j)),
            pl.BlockSpec((bc, 1), lambda i, j: (i, 0)),
            pl.BlockSpec((bc, 1), lambda i, j: (i, 0)),
        ],
        out_specs=pl.BlockSpec((bc, ts), lambda i, j: (i, j)),
        compiler_params=pltpu.CompilerParams(
            dimension_semantics=("parallel", "parallel"),
            vmem_limit_bytes=vmem_limit,
        ),
    )(x2d, row_scale, row_shift)


# ---------------------------------------------------------------------------
# Module
# ---------------------------------------------------------------------------
class BalancedBNV5:
    """JAX/Pallas port of TRIBE BalancedBNV5 (inference path, label=None)."""

    def __init__(self, num_features, num_classes=1, momentum_a=0.1, gamma=0.0,
                 eps=1e-5, key=None):
        self.num_features = num_features
        self.num_classes = num_classes
        self.eps = eps
        self.momentum = momentum_a
        self.gamma = gamma

        if key is None:
            key = jax.random.PRNGKey(0)
        k_m, k_v, k_w, k_b = jax.random.split(key, 4)
        # Deterministic synthetic "running stats" / affine params (stand-in for
        # the deepcopy of an existing nn.BatchNorm2d's buffers & parameters).
        self.global_mean = jax.random.normal(k_m, (num_features,), jnp.float32) * 0.1
        self.global_var = jax.random.uniform(k_v, (num_features,), jnp.float32,
                                             minval=0.5, maxval=1.5)
        self.weight = jax.random.normal(k_w, (num_features,), jnp.float32) * 0.1 + 1.0
        self.bias = jax.random.normal(k_b, (num_features,), jnp.float32) * 0.1

        # local_mean / local_var: per-class copies of the global stats.
        self.local_mean = jnp.broadcast_to(self.global_mean[None, :],
                                           (num_classes, num_features)).copy()
        self.local_var = jnp.broadcast_to(self.global_var[None, :],
                                          (num_classes, num_features)).copy()
        self.label = None

    def __call__(self, x):
        """x: (N, C, H, W) float32 (NCHW, as in PyTorch)."""
        # The .detach() calls of the original forward are no-ops here (plain
        # jnp arrays, no autodiff tape attached).
        N, C, H, W = x.shape
        assert C == self.num_features
        x = x.astype(jnp.float32)

        # Fold BN params into a single per-channel FMA: y = x * scale + shift.
        inv_std = jax.lax.rsqrt(self.global_var + self.eps)
        scale = self.weight * inv_std
        shift = self.bias - self.global_mean * scale

        # NCHW-native: flatten to (N*C, H*W) -- a free reshape (no transpose).
        rows = N * C
        x2d = x.reshape(rows, H * W)
        row_scale = jnp.tile(scale, N).reshape(rows, 1)   # channel of row r is r % C
        row_shift = jnp.tile(shift, N).reshape(rows, 1)

        y2d = _bn_apply_pallas(x2d, row_scale, row_shift)
        return y2d.reshape(N, C, H, W)


# ---------------------------------------------------------------------------
# Reference + self-test
# ---------------------------------------------------------------------------
def _reference_forward(x, mean, var, w, b, eps):
    # Pure-JAX reference in NCHW, matching F.batch_norm inference semantics.
    m = mean[None, :, None, None]
    v = var[None, :, None, None]
    return (x - m) / jnp.sqrt(v + eps) * w[None, :, None, None] + b[None, :, None, None]


if __name__ == "__main__":
    key = jax.random.PRNGKey(0)
    k_x, k_p = jax.random.split(key)

    N, C, H, W = 2, 4, 16, 16
    x = jax.random.normal(k_x, (N, C, H, W), jnp.float32)

    module = BalancedBNV5(num_features=C, num_classes=1, momentum_a=0.1,
                          gamma=0.0, eps=1e-5, key=k_p)

    y = module(x)
    y = jax.block_until_ready(y)

    y_ref = _reference_forward(x, module.global_mean, module.global_var,
                               module.weight, module.bias, module.eps)
    assert y.shape == x.shape and y.dtype == jnp.float32
    assert jnp.allclose(y, y_ref, atol=1e-5, rtol=1e-5), "mismatch vs reference"

    print("KERNEL_OK")
</pallas_src>

<mosaic_0001>
module attributes {stable_mosaic.version = 11 : i64} {
  func.func @_bn_scale_shift_kernel(%arg0: i32, %arg1: i32, %arg2: memref<8x256xf32, #tpu.memory_space<vmem>>, %arg3: memref<8x1xf32, #tpu.memory_space<vmem>>, %arg4: memref<8x1xf32, #tpu.memory_space<vmem>>, %arg5: memref<8x256xf32, #tpu.memory_space<vmem>>) attributes {dimension_semantics = [#tpu.dimension_semantics<parallel>, #tpu.dimension_semantics<parallel>], iteration_bounds = array<i64: 1, 1>, scalar_prefetch = 0 : i64, scratch_operands = 0 : i64, tpu.core_type = #tpu.core_type<tc>, window_params = [{transform_indices = @transform_0, window_bounds = array<i64: 8, 256>}, {transform_indices = @transform_1, window_bounds = array<i64: 8, 1>}, {transform_indices = @transform_2, window_bounds = array<i64: 8, 1>}, {transform_indices = @transform_3, window_bounds = array<i64: 8, 256>}]} {
    %c0 = arith.constant 0 : index
    %c0_0 = arith.constant 0 : index
    %0 = vector.load %arg2[%c0, %c0_0] : memref<8x256xf32, #tpu.memory_space<vmem>>, vector<8x256xf32>
    %c0_1 = arith.constant 0 : index
    %c0_2 = arith.constant 0 : index
    %1 = vector.load %arg3[%c0_1, %c0_2] : memref<8x1xf32, #tpu.memory_space<vmem>>, vector<8x1xf32>
    %2 = vector.broadcast %1 : vector<8x1xf32> to vector<8x256xf32>
    %3 = arith.mulf %0, %2 : vector<8x256xf32>
    %c0_3 = arith.constant 0 : index
    %c0_4 = arith.constant 0 : index
    %4 = vector.load %arg4[%c0_3, %c0_4] : memref<8x1xf32, #tpu.memory_space<vmem>>, vector<8x1xf32>
    %5 = vector.broadcast %4 : vector<8x1xf32> to vector<8x256xf32>
    %6 = arith.addf %3, %5 : vector<8x256xf32>
    %c0_5 = arith.constant 0 : index
    %c0_6 = arith.constant 0 : index
    %7 = vector.load %arg5[%c0_5, %c0_6] : memref<8x256xf32, #tpu.memory_space<vmem>>, vector<8x256xf32>
    tpu.vector_store %arg5[%c0_5, %c0_6], %6 {strides = array<i32>} : memref<8x256xf32, #tpu.memory_space<vmem>>, vector<8x256xf32>,
    return
  }
  func.func @transform_0(%arg0: i32, %arg1: i32) -> (i32, i32) {
    %c0_i32 = arith.constant 0 : i32
    return %arg0, %arg1 : i32, i32
  }
  func.func @transform_1(%arg0: i32, %arg1: i32) -> (i32, i32) {
    %c0_i32 = arith.constant 0 : i32
    %c0_i32_0 = arith.constant 0 : i32
    return %arg0, %c0_i32 : i32, i32
  }
  func.func @transform_2(%arg0: i32, %arg1: i32) -> (i32, i32) {
    %c0_i32 = arith.constant 0 : i32
    %c0_i32_0 = arith.constant 0 : i32
    return %arg0, %c0_i32 : i32, i32
  }
  func.func @transform_3(%arg0: i32, %arg1: i32) -> (i32, i32) {
    %c0_i32 = arith.constant 0 : i32
    return %arg0, %arg1 : i32, i32
  }
}

</mosaic_0001>

<bundles_post_ra>
// kernel: tpu_custom_call.1
= control target key start
LH: loop header
LB: loop body
LE: loop exit
PB: predicated region body
PF: predicated region fallthrough
CT: control target
= control target key end

     0   :  { %v74_v1 = vmov 0   ;;  %s111_s0 = inlined_call_operand.vmem [shape: f32[8,256], index: 0, kind: input, shape index: {}]   ;;  %s112_s1 = inlined_call_operand.vmem [shape: f32[8,1], index: 1, kind: input, shape index: {}]   ;;  %s113_s2 = inlined_call_operand.vmem [shape: f32[8,1], index: 2, kind: input, shape index: {}]   ;;  %s114_s3 = inlined_call_operand.hbm [shape: f32[8,256], index: 3, kind: output, shape index: {}]  }
   0x1   :  { %v17_v0 = vld [vmem:[%s112_s1] sm:$0xff]  ;;  %51 = vset.pattern.permute.xlu0 %v74_v1 }
   0x2   :  { %8 = vsyncpa [#allocation3], 0  ;;  %20 = vperm.xlu0 %51, %v17_v0   ;;  %v25_v2 = vld [vmem:[%s113_s2] sm:$0xff]  ;;  %v16_v5 = vld [vmem:[%s111_s0 + $0x8] sm:$0xff]  ;;  %s75_s20 = smov [#allocation2]  }
   0x3   :  { %v15_v4 = vld [vmem:[%s111_s0] sm:$0xff]  ;;  %s41_s1 = sshll.u32 %s75_s20, 4  ;;  %s42_s1 = int_to_ptr.vmem [resolvable:$true] %s41_s1 }
   0x4   :  { %s52_s2 = scalar_lea.vmem %s42_s1, 256  ;;  %p57_p1 = scmp.lt.s32.totalorder %s42_s1, %s42_s1 }
   0x5   :  { %p53_p0 = scmp.ne.s32.totalorder %s42_s1, %s52_s2  ;;  %p58_p2 = scmp.lt.s32.totalorder %s52_s2, %s52_s2 }
   0x6   :  { %28 = vperm.xlu0 %51, %v25_v2  }
   0x7   :  { %p59_p3 = por %p58_p2, %p57_p1 }
   0x9   :  { %p60_p4 = pnand %p59_p3, %p53_p0 }
  0x7d   :  { %v21_v3 = vpop.permute.xlu0 %20 }
  0x7e   :  { %v23_v6 = vmul.f32 %v21_v3, %v15_v4  ;;  %v24_v7 = vmul.f32 %v21_v3, %v16_v5 }
  0x81   :  { %v29_v8 = vpop.permute.xlu0 %28 }
  0x82   :  { %v31_v9 = vadd.f32 %v29_v8, %v23_v6  ;;  %v32_v10 = vadd.f32 %v29_v8, %v24_v7 }
  0x84   :  { %33 = vst [vmem:[#allocation2] sm:$0xff] %v31_v9  ;;  %34 = vst [vmem:[#allocation2 + $0x8] sm:$0xff] %v32_v10 }
  0x85   :  { %63 = shalt.err (!%p60_p4)
}
  0x86   :  { %44 = dma.vmem_to_hbm [thread:$0]  %s42_s1, 256, %s114_s3, [#allocation3]  }
  0x87   :  { %72 = dma.done.wait [#allocation3], 256  }
  0x88   :  { %73 = vsyncadd [#allocation3], 4294967040 }
  0x89   :  { %48 = vsyncpa [#allocation3], 1 }

</bundles_post_ra>
